<compile_context>
chip_gen: v5e
topology: v5e:2x2
jax: 0.10.0
libtpu: 0.0.40
codegen_flags: <defaults>
</compile_context>

<pallas_src>
import jax
import jax.numpy as jnp
from jax.experimental import pallas as pl
from jax.experimental.pallas import tpu as pltpu


# ----------------------------------------------------------------------------
# Fused kernel: per position-tile (full batch, full vocab), compute
#   probs = softmax(logits) in-register,
#   E[b, t]   = sum_v exp(probs[b, t, v])
#   Dot[b, t] = <probs[b, t], probs[b+1, t]>            for b <  B-1
#               <probs[B-1, t], probs[0, t+1]>          for b == B-1  (wrap row;
#                 the t == TS-1 entry crosses the tile boundary -> patched in glue)
# plus the two boundary probability rows needed for the cross-tile patch.
# ----------------------------------------------------------------------------
def _diversity_stats_kernel(x_ref, e_ref, dot_ref, first_ref, last_ref):
    x = x_ref[...]                                        # (B, TS, V), native dtype
    Bk, TS, V = x.shape

    # Softmax pieces.  Row max is exact in the native dtype; the f32 upcast is fused
    # into the exp argument so no long-lived f32 copy of the input is kept around.
    m = jnp.max(x, axis=-1, keepdims=True)                                # (B, TS, 1)
    ex = jnp.exp(x.astype(jnp.float32) - m.astype(jnp.float32))           # (B, TS, V)
    denom = jnp.sum(ex, axis=-1, keepdims=True)                           # (B, TS, 1)
    inv = pl.reciprocal(denom, approx=False)              # per-row 1/denom (tiny array)
    inv2d = inv[..., 0]                                   # (B, TS)

    # E table: sum_v exp(p) with p = ex * inv fused into the exp argument
    # (probabilities are never materialized for the whole tile).
    # TODO(synk): if bundle dumps show VALU/EUP saturation on v6e/v7x with bf16
    # inputs, offload the sum-over-V reductions to the idle MXU ([rows,V] @ [V,1]).
    e_ref[0] = jnp.sum(jnp.exp(ex * inv), axis=-1)        # (B, TS)

    # Dots via <p_a, p_b> = <ex_a, ex_b> * inv_a * inv_b.
    # wrap row (b = B-1): <p[B-1, t], p[0, t+1]>.  Use an XLU sublane roll of the
    # normalized batch-0 row instead of an offset-1 sublane slice (which would force
    # a misaligned (TS-1, V) copy).  shift = TS-1 == -1 (mod TS) under jnp.roll
    # semantics; the wrapped t == TS-1 entry is masked and patched across tiles in
    # the wrapper.
    p0 = ex[0:1] * inv[0:1]                               # (1, TS, V) = 1/B of a tile
    p0_next = pltpu.roll(p0, shift=TS - 1, axis=1)        # position t holds p[0, t+1]
    wrap = jnp.sum(ex[Bk - 1:Bk] * p0_next, axis=-1) * inv2d[Bk - 1:Bk]   # (1, TS)
    col = jax.lax.broadcasted_iota(jnp.int32, (1, TS), 1)
    wrap = jnp.where(col < TS - 1, wrap, 0.0)

    if Bk > 1:
        d_same = (jnp.sum(ex[:Bk - 1] * ex[1:], axis=-1)
                  * inv2d[:Bk - 1] * inv2d[1:])           # (B-1, TS)
        dot_ref[0] = jnp.concatenate([d_same, wrap], axis=0)   # one dense store
    else:
        dot_ref[0] = wrap

    # Boundary probability rows for the cross-tile wrap patch (done in the wrapper).
    first_ref[...] = p0[:, 0:1, :]                        # probs[0, first pos of tile]
    last_ref[...] = (ex[Bk - 1:Bk, TS - 1:TS, :]
                     * inv[Bk - 1:Bk, TS - 1:TS, :])      # probs[B-1, last pos of tile]


# ----------------------------------------------------------------------------
# Generation-aware tile sizing.
# ----------------------------------------------------------------------------
def _vmem_capacity_bytes():
    """Physical VMEM per TensorCore; conservative fallback if the query fails."""
    try:
        info = pltpu.get_tpu_info()
        cap = int(getattr(info, "vmem_capacity_bytes", 0) or 0)
        if cap > 0:
            return cap
    except Exception:
        pass
    return 64 * 1024 * 1024          # v7x per-core size: safe lower bound everywhere


_F32_TEMPS = 4   # upper bound on live full-size f32 temporaries in the fused body


def _choose_tile_positions(B, S, V, in_bytes, vmem_cap):
    """Positions per grid step.

    budget = 3/8 of physical VMEM (~24 MiB on v7x's 64 MiB parts, ~48 MiB on
    v5e/v6e's 128 MiB parts).  Per position we count the double-buffered input block
    plus ~_F32_TEMPS live f32 temporaries.  When S allows, the tile is capped so the
    grid has >= 2 steps: the "parallel" axis then shards across both v7x TensorCores
    and the DMA pipeline has >= 2 stages.
    """
    per_pos = B * V * (2 * in_bytes + _F32_TEMPS * 4)
    budget = (vmem_cap * 3) // 8
    ts = int(budget // max(per_pos, 1))
    if S >= 16:
        cap2 = (((S + 1) // 2 + 7) // 8) * 8     # round8up(ceil(S/2)) <= S for S >= 16
        ts = min(ts, cap2)
    if ts >= S:
        return int(S)
    ts = (ts // 8) * 8                            # second-minor block dim: multiple of 8
    if ts >= 8:
        return int(min(ts, S))
    # Even the minimum legal 8-position tile overshoots the budget (very large B*V).
    # TODO(synk): tile the vocab axis (two-pass online softmax) or the batch axis
    # (needs batch-boundary dot fixups); for now take TS=8 and raise the VMEM limit.
    return int(min(8, S))


def _diversity_stats(logits, tile_positions=None):
    B, S, V = logits.shape
    in_bytes = jnp.dtype(logits.dtype).itemsize
    vmem_cap = _vmem_capacity_bytes()
    if tile_positions is None:
        TS = _choose_tile_positions(B, S, V, in_bytes, vmem_cap)
    else:
        TS = int(min(tile_positions, S))
        if TS < S:
            TS = min(S, max(8, (TS // 8) * 8))   # keep the block (8,128)-legal
    G = pl.cdiv(S, TS)

    per_pos = B * V * (2 * in_bytes + _F32_TEMPS * 4)
    needed = TS * per_pos + (4 << 20)
    vmem_limit = int(min(max((vmem_cap * 3) // 4, needed), (vmem_cap * 9) // 10))

    cost = pl.CostEstimate(
        flops=int(7 * B * S * V),
        transcendentals=int(2 * B * S * V),
        bytes_accessed=int(B * S * V * in_bytes + 8 * B * S + 8 * G * V),
    )

    out_shape = (
        jax.ShapeDtypeStruct((G, B, TS), jnp.float32),   # E
        jax.ShapeDtypeStruct((G, B, TS), jnp.float32),   # Dot (pre-patch)
        jax.ShapeDtypeStruct((G, 1, V), jnp.float32),    # probs[0, g*TS]
        jax.ShapeDtypeStruct((G, 1, V), jnp.float32),    # probs[B-1, g*TS + TS - 1]
    )
    e_out, dot_out, first_rows, last_rows = pl.pallas_call(
        _diversity_stats_kernel,
        out_shape=out_shape,
        grid=(G,),
        in_specs=[pl.BlockSpec((B, TS, V), lambda g: (0, g, 0))],
        out_specs=(
            pl.BlockSpec((1, B, TS), lambda g: (g, 0, 0)),
            pl.BlockSpec((1, B, TS), lambda g: (g, 0, 0)),
            pl.BlockSpec((1, 1, V), lambda g: (g, 0, 0)),
            pl.BlockSpec((1, 1, V), lambda g: (g, 0, 0)),
        ),
        compiler_params=pltpu.CompilerParams(
            dimension_semantics=("parallel",),           # no cross-step state
            vmem_limit_bytes=vmem_limit,
        ),
        cost_estimate=cost,
    )(logits)
    return e_out, dot_out, first_rows, last_rows, TS, G


# ----------------------------------------------------------------------------
# Module forward: one fused kernel pass over the logits, then O(N*B*S) scalar glue.
# ----------------------------------------------------------------------------
def diversity_penalty_forward(logits, target, N=2, coefs=None,
                              ignore_index=0, label_smoothing=0.0,
                              tile_positions=None):
    """logits: (B, S, V) float; target: (B, S) int ids (unused, see header)."""
    del target, ignore_index, label_smoothing  # no effect in the reference forward
    if coefs is None:
        coefs = [1.0] * N
    assert len(coefs) == N

    B, S, V = logits.shape
    e_out, dot_out, first_rows, last_rows, TS, G = _diversity_stats(
        logits, tile_positions=tile_positions)

    # [g, b, t] -> [s, b]  (s = g*TS + t), then flatten to f = s*B + b
    E_sb = jnp.transpose(e_out, (0, 2, 1)).reshape(G * TS, B)[:S]
    D_sb = jnp.transpose(dot_out, (0, 2, 1)).reshape(G * TS, B)[:S]
    if G > 1:
        # patch the cross-tile wrap dots: <probs[B-1, (g+1)*TS-1], probs[0, (g+1)*TS]>
        bvals = jnp.sum(last_rows[:-1, 0, :] * first_rows[1:, 0, :], axis=-1)  # (G-1,)
        sidx = jnp.arange(1, G) * TS - 1
        D_sb = D_sb.at[sidx, B - 1].set(bvals)

    E_flat = E_sb.reshape(-1)   # E_flat[f],  f = s*B + b
    D_flat = D_sb.reshape(-1)   # D_flat[f] = <P[f], P[f+1]>  (f = B*S-1 unused)

    total = jnp.zeros((), jnp.float32)
    for n in range(1, N + 1):
        vp = S - n + 1
        if vp <= 1:
            # TODO(synk): vp == 1 divides by zero (0.0 / 0) in the reference; skipped
            # here instead of poisoning the loss with NaN/Inf.
            continue
        k = jnp.arange(B * vp)
        valid = (k % vp) != (vp - 1)
        j = jnp.arange(n) * B
        e_idx = jnp.minimum((k + 1)[:, None] + j[None, :], B * S - 1)
        d_idx = k[:, None] + j[None, :]
        lse = jnp.log(jnp.sum(E_flat[e_idx], axis=-1))      # logsumexp over the n*V row
        dsum = jnp.sum(D_flat[d_idx], axis=-1)
        ce = n * lse - dsum                                  # per-pair soft-target CE
        ce_sum = jnp.sum(jnp.where(valid, ce, 0.0))
        avg_ce = ce_sum / jnp.float32(B * (vp - 1))
        total = total + jnp.float32(-coefs[n - 1]) * avg_ce
    return total


# ----------------------------------------------------------------------------
# Pure-JAX reference (mirrors the torch code) for validation.
# ----------------------------------------------------------------------------
def diversity_penalty_ref(logits, N=2, coefs=None):
    if coefs is None:
        coefs = [1.0] * N
    B, S, V = logits.shape
    probs = jax.nn.softmax(logits.astype(jnp.float32), axis=-1)
    total = 0.0
    for n in range(1, N + 1):
        vp = S - n + 1
        if vp <= 1:
            continue
        M = jnp.stack([probs[:, i:i + n, :] for i in range(vp)]).reshape(B, vp, n * V)
        ce_loss = 0.0
        for i in range(vp - 1):
            cur = M[:, i, :]
            nxt = M[:, i + 1, :]
            logp = jax.nn.log_softmax(nxt, axis=-1)
            ce_loss = ce_loss + jnp.mean(-jnp.sum(cur * logp, axis=-1))
        total = total + (-coefs[n - 1]) * (ce_loss / (vp - 1))
    return jnp.asarray(total, jnp.float32)


if __name__ == "__main__":
    key = jax.random.PRNGKey(0)
    k1, k2, k3, k4 = jax.random.split(key, 4)

    N = 2
    coefs = [1.0, 1.0]

    # Test 1: small f32, single tile (G == 1).
    B, S, V = 2, 8, 128
    logits = jax.random.normal(k1, (B, S, V), dtype=jnp.float32)
    target = jax.random.randint(k2, (B, S), 0, V, dtype=jnp.int32)  # unused by the loss
    out = jax.block_until_ready(
        diversity_penalty_forward(logits, target, N=N, coefs=coefs))
    ref = diversity_penalty_ref(logits, N=N, coefs=coefs)
    assert bool(jnp.isfinite(out)), f"non-finite loss: {out}"
    assert jnp.allclose(out, ref, rtol=1e-4, atol=1e-4), (out, ref)

    # Test 2: multi-tile grid (explicit TS=8 -> G=4) exercising the cross-tile patch.
    B2, S2, V2 = 2, 32, 128
    logits2 = jax.random.normal(k3, (B2, S2, V2), dtype=jnp.float32)
    out2 = jax.block_until_ready(
        diversity_penalty_forward(logits2, None, N=N, coefs=coefs, tile_positions=8))
    ref2 = diversity_penalty_ref(logits2, N=N, coefs=coefs)
    assert jnp.allclose(out2, ref2, rtol=1e-4, atol=1e-4), (out2, ref2)

    # Test 2b: same input through the automatic chooser (TS = S/2 -> G = 2),
    # exercising the >=2-grid-steps / megacore policy.
    out2b = jax.block_until_ready(
        diversity_penalty_forward(logits2, None, N=N, coefs=coefs))
    assert jnp.allclose(out2b, ref2, rtol=1e-4, atol=1e-4), (out2b, ref2)

    # Test 3: ragged last tile (S % TS != 0) together with cross-tile boundary patches.
    B4, S4, V4 = 2, 20, 128
    logits4 = jax.random.normal(k4, (B4, S4, V4), dtype=jnp.float32)
    out4 = jax.block_until_ready(
        diversity_penalty_forward(logits4, None, N=N, coefs=coefs, tile_positions=8))
    ref4 = diversity_penalty_ref(logits4, N=N, coefs=coefs)
    assert jnp.allclose(out4, ref4, rtol=1e-4, atol=1e-4), (out4, ref4)

    # Test 4: bf16 logits stay bf16 in HBM/VMEM; upcast is fused in-register in-kernel.
    logits3 = logits.astype(jnp.bfloat16)
    out3 = jax.block_until_ready(
        diversity_penalty_forward(logits3, target, N=N, coefs=coefs))
    ref3 = diversity_penalty_ref(logits3, N=N, coefs=coefs)
    assert jnp.allclose(out3, ref3, rtol=1e-4, atol=1e-4), (out3, ref3)

    print("KERNEL_OK")
</pallas_src>

<mosaic_0001>
module attributes {stable_mosaic.version = 11 : i64} {
  func.func @_diversity_stats_kernel(%arg0: i32, %arg1: memref<2x8x128xf32, #tpu.memory_space<vmem>>, %arg2: memref<1x2x8xf32, #tpu.memory_space<vmem>>, %arg3: memref<1x2x8xf32, #tpu.memory_space<vmem>>, %arg4: memref<1x1x128xf32, #tpu.memory_space<vmem>>, %arg5: memref<1x1x128xf32, #tpu.memory_space<vmem>>) attributes {dimension_semantics = [#tpu.dimension_semantics<parallel>], iteration_bounds = array<i64: 1>, scalar_prefetch = 0 : i64, scratch_operands = 0 : i64, tpu.core_type = #tpu.core_type<tc>, window_params = [{transform_indices = @transform_0, window_bounds = array<i64: 2, 8, 128>}, {transform_indices = @transform_1, window_bounds = array<i64: 1, 2, 8>}, {transform_indices = @transform_2, window_bounds = array<i64: 1, 2, 8>}, {transform_indices = @transform_3, window_bounds = array<i64: 1, 1, 128>}, {transform_indices = @transform_4, window_bounds = array<i64: 1, 1, 128>}]} {
    %c0 = arith.constant 0 : index
    %c0_0 = arith.constant 0 : index
    %c0_1 = arith.constant 0 : index
    %0 = vector.load %arg1[%c0, %c0_0, %c0_1] : memref<2x8x128xf32, #tpu.memory_space<vmem>>, vector<2x8x128xf32>
    %cst = arith.constant dense<0xFF800000> : vector<2x8xf32>
    %1 = vector.multi_reduction <maximumf>, %0, %cst [2] : vector<2x8x128xf32> to vector<2x8xf32>
    %2 = vector.shape_cast %1 : vector<2x8xf32> to vector<2x8x1xf32>
    %3 = vector.broadcast %2 : vector<2x8x1xf32> to vector<2x8x128xf32>
    %4 = arith.subf %0, %3 : vector<2x8x128xf32>
    %5 = math.exp %4 : vector<2x8x128xf32>
    %cst_2 = arith.constant dense<0.000000e+00> : vector<2x8xf32>
    %6 = vector.multi_reduction <add>, %5, %cst_2 [2] : vector<2x8x128xf32> to vector<2x8xf32>
    %7 = vector.shape_cast %6 : vector<2x8xf32> to vector<2x8x1xf32>
    %8 = tpu.reciprocal %7 : vector<2x8x1xf32> -> vector<2x8x1xf32>
    %9 = vector.shape_cast %8 : vector<2x8x1xf32> to vector<2x8xf32>
    %10 = vector.broadcast %8 : vector<2x8x1xf32> to vector<2x8x128xf32>
    %11 = arith.mulf %5, %10 : vector<2x8x128xf32>
    %12 = math.exp %11 : vector<2x8x128xf32>
    %cst_3 = arith.constant dense<0.000000e+00> : vector<2x8xf32>
    %13 = vector.multi_reduction <add>, %12, %cst_3 [2] : vector<2x8x128xf32> to vector<2x8xf32>
    %c0_4 = arith.constant 0 : index
    %c0_5 = arith.constant 0 : index
    %c0_6 = arith.constant 0 : index
    %14 = vector.load %arg2[%c0_4, %c0_5, %c0_6] : memref<1x2x8xf32, #tpu.memory_space<vmem>>, vector<1x2x8xf32>
    %15 = vector.shape_cast %14 : vector<1x2x8xf32> to vector<2x8xf32>
    %16 = vector.shape_cast %13 : vector<2x8xf32> to vector<1x2x8xf32>
    tpu.vector_store %arg2[%c0_4, %c0_5, %c0_6], %16 {strides = array<i32>} : memref<1x2x8xf32, #tpu.memory_space<vmem>>, vector<1x2x8xf32>,
    %17 = vector.extract_strided_slice %5 {offsets = [0, 0, 0], sizes = [1, 8, 128], strides = [1, 1, 1]} : vector<2x8x128xf32> to vector<1x8x128xf32>
    %18 = vector.extract_strided_slice %8 {offsets = [0, 0, 0], sizes = [1, 8, 1], strides = [1, 1, 1]} : vector<2x8x1xf32> to vector<1x8x1xf32>
    %19 = vector.broadcast %18 : vector<1x8x1xf32> to vector<1x8x128xf32>
    %20 = arith.mulf %17, %19 : vector<1x8x128xf32>
    %c7_i32 = arith.constant 7 : i32
    %21 = tpu.dynamic_rotate %20 by %c7_i32 dim 1 : vector<1x8x128xf32>, i32 -> vector<1x8x128xf32>
    %22 = vector.extract_strided_slice %5 {offsets = [1, 0, 0], sizes = [1, 8, 128], strides = [1, 1, 1]} : vector<2x8x128xf32> to vector<1x8x128xf32>
    %23 = arith.mulf %22, %21 : vector<1x8x128xf32>
    %cst_7 = arith.constant dense<0.000000e+00> : vector<1x8xf32>
    %24 = vector.multi_reduction <add>, %23, %cst_7 [2] : vector<1x8x128xf32> to vector<1x8xf32>
    %25 = vector.extract_strided_slice %9 {offsets = [1, 0], sizes = [1, 8], strides = [1, 1]} : vector<2x8xf32> to vector<1x8xf32>
    %26 = arith.mulf %24, %25 : vector<1x8xf32>
    %27 = tpu.iota {dimensions = array<i32: 1>} : vector<1x8xi32>
    %c7_i32_8 = arith.constant 7 : i32
    %28 = vector.broadcast %c7_i32_8 : i32 to vector<1x8xi32>
    %29 = arith.cmpi slt, %27, %28 : vector<1x8xi32>
    %cst_9 = arith.constant 0.000000e+00 : f32
    %30 = vector.broadcast %cst_9 : f32 to vector<1x8xf32>
    %31 = arith.select %29, %26, %30 : vector<1x8xi1>, vector<1x8xf32>
    %32 = vector.extract_strided_slice %5 {offsets = [0, 0, 0], sizes = [1, 8, 128], strides = [1, 1, 1]} : vector<2x8x128xf32> to vector<1x8x128xf32>
    %33 = vector.extract_strided_slice %5 {offsets = [1, 0, 0], sizes = [1, 8, 128], strides = [1, 1, 1]} : vector<2x8x128xf32> to vector<1x8x128xf32>
    %34 = arith.mulf %32, %33 : vector<1x8x128xf32>
    %cst_10 = arith.constant dense<0.000000e+00> : vector<1x8xf32>
    %35 = vector.multi_reduction <add>, %34, %cst_10 [2] : vector<1x8x128xf32> to vector<1x8xf32>
    %36 = vector.extract_strided_slice %9 {offsets = [0, 0], sizes = [1, 8], strides = [1, 1]} : vector<2x8xf32> to vector<1x8xf32>
    %37 = arith.mulf %35, %36 : vector<1x8xf32>
    %38 = vector.extract_strided_slice %9 {offsets = [1, 0], sizes = [1, 8], strides = [1, 1]} : vector<2x8xf32> to vector<1x8xf32>
    %39 = arith.mulf %37, %38 : vector<1x8xf32>
    %40 = tpu.concatenate %39, %31 in 0 : vector<1x8xf32>, vector<1x8xf32> -> vector<2x8xf32>
    %c0_11 = arith.constant 0 : index
    %c0_12 = arith.constant 0 : index
    %c0_13 = arith.constant 0 : index
    %41 = vector.load %arg3[%c0_11, %c0_12, %c0_13] : memref<1x2x8xf32, #tpu.memory_space<vmem>>, vector<1x2x8xf32>
    %42 = vector.shape_cast %41 : vector<1x2x8xf32> to vector<2x8xf32>
    %43 = vector.shape_cast %40 : vector<2x8xf32> to vector<1x2x8xf32>
    tpu.vector_store %arg3[%c0_11, %c0_12, %c0_13], %43 {strides = array<i32>} : memref<1x2x8xf32, #tpu.memory_space<vmem>>, vector<1x2x8xf32>,
    %44 = vector.extract_strided_slice %20 {offsets = [0, 0, 0], sizes = [1, 1, 128], strides = [1, 1, 1]} : vector<1x8x128xf32> to vector<1x1x128xf32>
    %c0_14 = arith.constant 0 : index
    %c0_15 = arith.constant 0 : index
    %c0_16 = arith.constant 0 : index
    %45 = vector.load %arg4[%c0_14, %c0_15, %c0_16] : memref<1x1x128xf32, #tpu.memory_space<vmem>>, vector<1x1x128xf32>
    tpu.vector_store %arg4[%c0_14, %c0_15, %c0_16], %44 {strides = array<i32>} : memref<1x1x128xf32, #tpu.memory_space<vmem>>, vector<1x1x128xf32>,
    %46 = vector.extract_strided_slice %5 {offsets = [1, 7, 0], sizes = [1, 1, 128], strides = [1, 1, 1]} : vector<2x8x128xf32> to vector<1x1x128xf32>
    %47 = vector.extract_strided_slice %8 {offsets = [1, 7, 0], sizes = [1, 1, 1], strides = [1, 1, 1]} : vector<2x8x1xf32> to vector<1x1x1xf32>
    %48 = vector.broadcast %47 : vector<1x1x1xf32> to vector<1x1x128xf32>
    %49 = arith.mulf %46, %48 : vector<1x1x128xf32>
    %c0_17 = arith.constant 0 : index
    %c0_18 = arith.constant 0 : index
    %c0_19 = arith.constant 0 : index
    %50 = vector.load %arg5[%c0_17, %c0_18, %c0_19] : memref<1x1x128xf32, #tpu.memory_space<vmem>>, vector<1x1x128xf32>
    tpu.vector_store %arg5[%c0_17, %c0_18, %c0_19], %49 {strides = array<i32>} : memref<1x1x128xf32, #tpu.memory_space<vmem>>, vector<1x1x128xf32>,
    return
  }
  func.func @transform_0(%arg0: i32) -> (i32, i32, i32) {
    %c0_i32 = arith.constant 0 : i32
    %c0_i32_0 = arith.constant 0 : i32
    %c0_i32_1 = arith.constant 0 : i32
    return %c0_i32, %arg0, %c0_i32_0 : i32, i32, i32
  }
  func.func @transform_1(%arg0: i32) -> (i32, i32, i32) {
    %c0_i32 = arith.constant 0 : i32
    %c0_i32_0 = arith.constant 0 : i32
    %c0_i32_1 = arith.constant 0 : i32
    return %arg0, %c0_i32, %c0_i32_0 : i32, i32, i32
  }
  func.func @transform_2(%arg0: i32) -> (i32, i32, i32) {
    %c0_i32 = arith.constant 0 : i32
    %c0_i32_0 = arith.constant 0 : i32
    %c0_i32_1 = arith.constant 0 : i32
    return %arg0, %c0_i32, %c0_i32_0 : i32, i32, i32
  }
  func.func @transform_3(%arg0: i32) -> (i32, i32, i32) {
    %c0_i32 = arith.constant 0 : i32
    %c0_i32_0 = arith.constant 0 : i32
    %c0_i32_1 = arith.constant 0 : i32
    return %arg0, %c0_i32, %c0_i32_0 : i32, i32, i32
  }
  func.func @transform_4(%arg0: i32) -> (i32, i32, i32) {
    %c0_i32 = arith.constant 0 : i32
    %c0_i32_0 = arith.constant 0 : i32
    %c0_i32_1 = arith.constant 0 : i32
    return %arg0, %c0_i32, %c0_i32_0 : i32, i32, i32
  }
}

</mosaic_0001>

<bundles_post_ra>
// kernel: tpu_custom_call.1
= control target key start
LH: loop header
LB: loop body
LE: loop exit
PB: predicated region body
PF: predicated region fallthrough
CT: control target
= control target key end

     0   :  { %10 = vsyncpa [#allocation3], 0  ;;  %s383_s0 = inlined_call_operand.hbm [shape: f32[2,8,128], index: 0, kind: input, shape index: {}]   ;;  %s384_s1 = inlined_call_operand.hbm [shape: f32[1,2,8], index: 1, kind: output, shape index: {0}]   ;;  %s385_s2 = inlined_call_operand.hbm [shape: f32[1,2,8], index: 2, kind: output, shape index: {1}]   ;;  %s386_s3 = inlined_call_operand.hbm [shape: f32[1,1,128], index: 3, kind: output, shape index: {2}]   ;;  %s387_s4 = inlined_call_operand.hbm [shape: f32[1,1,128], index: 4, kind: output, shape index: {3}]  }
   0x1   :  { %11 = vsyncpa [#allocation4], 0 }
   0x2   :  { %12 = vsyncpa [#allocation7], 0 }
   0x3   :  { %13 = vsyncpa [#allocation10], 0  ;;  %s18_s17 = sshll.u32 %s383_s0, 4  ;;  %s333_s18 = smov [#allocation2]   ;;  %s19_s17 = int_to_ptr.hbm [resolvable:$true] %s18_s17 }
   0x4   :  { %s20_s19 = sshll.u32 %s333_s18, 4  ;;  %s334_s20 = smov 128   ;;  %s21_s19 = int_to_ptr.vmem [resolvable:$true] %s20_s19 }
   0x5   :  { %s335_s21 = smov 8  }
   0x6   :  { %26 = dma.hbm_to_vmem [thread:$0]  %s19_s17, 256, %s21_s19, [#allocation3], %s334_s20, %s334_s20, %s335_s21  }
   0x7   :  { %325 = dma.done.wait [#allocation3], 256  }
   0x8   :  { %326 = vsyncadd [#allocation3], 4294967040  ;;  %v31_v0 = vld [vmem:[#allocation2] sm:$0xff]  ;;  %v32_v1 = vld [vmem:[#allocation2 + $0x8] sm:$0xff]  ;;  %s162_s23 = sshll.u32 %s387_s4, 4  ;;  %s336_s24 = smov [#allocation9]   ;;  %v87_v41 = vlaneseq  ;;  %s163_s23 = int_to_ptr.hbm [resolvable:$true] %s162_s23 }
   0x9   :  { %33 = vmax.xlane.f32.xlu0 %v31_v0  ;;  %s160_s25 = sshll.u32 %s336_s24, 4  ;;  %s337_s26 = smov [#allocation6]   ;;  %vm117_vm9 = vcmask 1040384   ;;  %vm91_vm10 = vcmask 1041409   ;;  %vm94_vm11 = vcmask 58368   ;;  %s161_s25 = int_to_ptr.vmem [resolvable:$true] %s160_s25 }
   0xa   :  { %v88_v43 = vand.u32 127, %v87_v41  ;;  %s138_s4 = sshll.u32 %s337_s26, 4  ;;  %s140_s29 = sshll.u32 %s385_s2, 4  ;;  %s139_s4 = int_to_ptr.vmem [resolvable:$true] %s138_s4  ;;  %s141_s29 = int_to_ptr.hbm [resolvable:$true] %s140_s29 }
   0xb   :  { %s338_s30 = smov [#allocation5]   ;;  %s129_s8 = sshll.u32 %s384_s1, 4  ;;  %s130_s8 = int_to_ptr.hbm [resolvable:$true] %s129_s8 }
   0xc   :  { %vm101_vm8 = vcmp.lt.s32.totalorder %v88_v43, 7  ;;  %s127_s5 = sshll.u32 %s338_s30, 4  ;;  %s339_s9 = smov [#allocation8]   ;;  %s128_s5 = int_to_ptr.vmem [resolvable:$true] %s127_s5 }
   0xd   :  { %s149_s10 = sshll.u32 %s339_s9, 4  ;;  %s151_s13 = sshll.u32 %s386_s3, 4  ;;  %s150_s10 = int_to_ptr.vmem [resolvable:$true] %s149_s10  ;;  %s152_s13 = int_to_ptr.hbm [resolvable:$true] %s151_s13 }
  0x11   :  { %35 = vmax.xlane.f32.xlu0 %v32_v1 }
  0x7c   :  { %v34_v2 = vpop.xlane.xlu0 %33 }
  0x7d   :  { %v37_v3 = vsub.f32 %v31_v0, %v34_v2 }
  0x7f   :  { %v39_v4 = vmul.f32 1.442695, %v37_v3 }
  0x81   :  { %193 = vpow2.f32 %v39_v4 }
  0x84   :  { %v36_v5 = vpop.xlane.xlu0 %35 }
  0x85   :  { %v38_v6 = vsub.f32 %v32_v1, %v36_v5 }
  0x87   :  { %v194_v7 = vpop.eup %193  ;;  %v41_v8 = vmul.f32 1.442695, %v38_v6 }
  0x88   :  { %43 = vadd.xlane.f32.xlu1 %v194_v7 }
  0x89   :  { %195 = vpow2.f32 %v41_v8 }
  0x8f   :  { %v196_v9 = vpop.eup %195 }
  0x90   :  { %45 = vadd.xlane.f32.xlu1 %v196_v9  ;;  %v106_v39 = vmul.f32 %v196_v9, %v194_v7 }
  0xfb   :  { %v44_v10 = vpop.xlane.xlu1 %43 }
  0xfc   :  { %197 = vrcp.f32 %v44_v10  ;;  %v58_v15 = vand.u32 2147483648, %v44_v10  ;;  %v56_v17 = vand.u32 2147483647, %v44_v10  ;;  %vm52_vm1 = vweird.f32 %v44_v10 }
  0xfe   :  { %v59_v20 = vor.u32 1.1754944e-38, %v58_v15  ;;  %vm57_vm3 = vcmp.eq.f32.partialorder %v56_v17, 8.507059e+37 }
 0x102   :  { %v198_v11 = vpop.eup %197 }
 0x103   :  { %v48_v12 = vmul.f32 %v198_v11, %v44_v10  ;;  %v46_v13 = vpop.xlane.xlu1 %45  ;;  %vm53_vm0 = vweird.f32 %v198_v11 }
 0x104   :  { %199 = vrcp.f32 %v46_v13  ;;  %vm54_vm2 = vmor %vm52_vm1, %vm53_vm0  ;;  %v70_v26 = vand.u32 2147483647, %v46_v13  ;;  %v72_v27 = vand.u32 2147483648, %v46_v13  ;;  %vm66_vm5 = vweird.f32 %v46_v13 }
 0x105   :  { %v49_v14 = vsub.f32 1.0, %v48_v12 }
 0x106   :  { %v73_v33 = vor.u32 1.1754944e-38, %v72_v27  ;;  %vm71_vm7 = vcmp.eq.f32.partialorder %v70_v26, 8.507059e+37 }
 0x107   :  { %v50_v16 = vmul.f32 %v198_v11, %v49_v14 }
 0x109   :  { %v51_v18 = vadd.f32 %v198_v11, %v50_v16 }
 0x10a   :  { %v200_v19 = vpop.eup %199 }
 0x10b   :  { %v62_v21 = vmul.f32 %v200_v19, %v46_v13  ;;  %v55_v22 = vsel %vm54_vm2, %v198_v11, %v51_v18  ;;  %vm67_vm4 = vweird.f32 %v200_v19 }
 0x10c   :  { %v60_v23 = vsel %vm57_vm3, %v59_v20, %v55_v22  ;;  %vm68_vm6 = vmor %vm66_vm5, %vm67_vm4 }
 0x10d   :  { %v63_v24 = vsub.f32 1.0, %v62_v21  ;;  %v75_v25 = vmul.f32 %v194_v7, %v60_v23 }
 0x10f   :  { %v64_v28 = vmul.f32 %v200_v19, %v63_v24  ;;  %v96_v29 = vrot.slane %v75_v25, 1  ;;  %120 = vst [vmem:[#allocation8] sm:$0x1] %v75_v25  ;;  %v77_v30 = vmul.f32 1.442695, %v75_v25 }
 0x111   :  { %v65_v31 = vadd.f32 %v200_v19, %v64_v28  ;;  %v97_v32 = vmul.f32 %v196_v9, %v96_v29  ;;  %201 = vpow2.f32 %v77_v30 }
 0x113   :  { %v69_v34 = vsel %vm68_vm6, %v200_v19, %v65_v31  ;;  %98 = vadd.xlane.f32.xlu2 %v97_v32 }
 0x114   :  { %v74_v35 = vsel %vm71_vm7, %v73_v33, %v69_v34 }
 0x115   :  { %v76_v36 = vmul.f32 %v196_v9, %v74_v35 }
 0x117   :  { %v202_v37 = vpop.eup %201  ;;  %v79_v38 = vmul.f32 1.442695, %v76_v36  ;;  %121 = vst [vmem:[#allocation9 - $0x7] sm:$0x80] %v76_v36 }
 0x118   :  { %81 = vadd.xlane.f32.xlu0 %v202_v37  ;;  %165 = dma.vmem_to_hbm [thread:$0]  %s161_s25, 16, %s163_s23, [#allocation10]  }
 0x119   :  { %203 = vpow2.f32 %v79_v38 }
 0x11b   :  { %107 = vadd.xlane.f32.xlu2 %v106_v39 }
 0x11f   :  { %v204_v40 = vpop.eup %203 }
 0x120   :  { %83 = vadd.xlane.f32.xlu1 %v204_v40 }
 0x186   :  { %v99_v42 = vpop.xlane.xlu2 %98 }
 0x187   :  { %v100_v44 = vmul.f32 %v99_v42, %v74_v35 }
 0x189   :  { %v103_v45 = vperm.slane %v100_v44, %v88_v43 }
 0x18b   :  { %v105_v48 = vsel %vm101_vm8, %v103_v45, 0.0  ;;  %v82_v49 = vpop.xlane.xlu0 %81 }
 0x18c   :  { %v115_v51 = vrot.slane %v105_v48, 7  ;;  %v89_v54 = vperm.slane %v82_v49, %v88_v43 }
 0x18e   :  { %v108_v46 = vpop.xlane.xlu2 %107 }
 0x18f   :  { %v109_v47 = vmul.f32 %v108_v46, %v60_v23 }
 0x191   :  { %v110_v50 = vmul.f32 %v109_v47, %v74_v35 }
 0x193   :  { %v112_v52 = vperm.slane %v110_v50, %v88_v43  ;;  %v84_v53 = vpop.xlane.xlu1 %83 }
 0x194   :  { %v90_v55 = vperm.slane %v84_v53, %v88_v43 }
 0x195   :  { %v118_v56 = vsel %vm117_vm9, %v112_v52, %v115_v51 }
 0x196   :  { %v92_v57 = vsel %vm91_vm10, %v90_v55, %v89_v54  ;;  %119 = vst.msk [vmem:[#allocation6] sm:$0x3] %vm94_vm11, %v118_v56 }
 0x197   :  { %143 = dma.vmem_to_hbm [thread:$0]  %s139_s4, 32, %s141_s29, [#allocation7]   ;;  %95 = vst.msk [vmem:[#allocation5] sm:$0x3] %vm94_vm11, %v92_v57 }
 0x198   :  { %132 = dma.vmem_to_hbm [thread:$0]  %s128_s5, 32, %s130_s8, [#allocation4]  }
 0x199   :  { %154 = dma.vmem_to_hbm [thread:$0]  %s150_s10, 16, %s152_s13, [#allocation7]  }
 0x19a   :  { %327 = dma.done.wait [#allocation4], 32  }
 0x19b   :  { %328 = vsyncadd [#allocation4], 4294967264 }
 0x19c   :  { %329 = dma.done.wait [#allocation7], 48  }
 0x19d   :  { %330 = vsyncadd [#allocation7], 4294967248 }
 0x19e   :  { %331 = dma.done.wait [#allocation10], 16  }
 0x19f   :  { %332 = vsyncadd [#allocation10], 4294967280 }
 0x1a0   :  { %182 = vsyncpa [#allocation3], 1 }
 0x1a1   :  { %183 = vsyncpa [#allocation4], 1 }
 0x1a2   :  { %184 = vsyncpa [#allocation7], 1 }
 0x1a3   :  { %185 = vsyncpa [#allocation10], 1 }

</bundles_post_ra>
